<compile_context>
chip_gen: v6e
topology: v6e:2x2x1
jax: 0.10.0
libtpu: 0.0.40
codegen_flags: <defaults>
</compile_context>

<pallas_src>
import jax
import jax.numpy as jnp
from jax import lax
from jax.experimental import pallas as pl
from jax.experimental.pallas import tpu as pltpu

_LANES = 128
_SUBLANES = 8


def _make_kernel(*, is_complex, block_rows, chunk_rows, total_rows, need_mask,
                 use_bf16_log):
    """Builds the kernel body for a (block_rows, 128) block of diff planes."""
    n_chunks = block_rows // chunk_rows

    def kernel(inv_c2_ref, *refs):
        if is_complex:
            dr_ref, di_ref, out_ref = refs
        else:
            dr_ref, out_ref = refs
            di_ref = None

        inv_c2 = inv_c2_ref[0, 0]                      # SMEM scalar (1 sld)
        base_row = pl.program_id(0) * block_rows

        acc = jnp.zeros((_SUBLANES, _LANES), jnp.float32)
        for ci in range(n_chunks):                     # static, fully unrolled
            r0 = ci * chunk_rows
            dr = dr_ref[r0:r0 + chunk_rows, :]
            mag2 = dr * dr
            if di_ref is not None:
                di = di_ref[r0:r0 + chunk_rows, :]
                mag2 = mag2 + di * di
            if need_mask:
                # Last grid block may extend past `total_rows`; the clamped DMA
                # leaves garbage there.  Zero it before the log (log(1+0)=0).
                local = lax.broadcasted_iota(jnp.int32, (chunk_rows, _LANES), 0)
                mag2 = jnp.where(base_row + r0 + local < total_rows, mag2, 0.0)
            arg = 1.0 + mag2 * inv_c2
            if use_bf16_log:
                # v7x/v6e EUP bf16 path (~2x log throughput); off by default.
                t = jnp.log(arg.astype(jnp.bfloat16)).astype(jnp.float32)
            else:
                t = jnp.log(arg)
            # Reduce the (chunk, 128) map onto one (8, 128) vreg-shaped tile;
            # the reshape only splits the major dim (free), sum is vreg adds.
            acc = acc + jnp.sum(
                t.reshape(chunk_rows // _SUBLANES, _SUBLANES, _LANES), axis=0)

        out_ref[0] = acc                               # lane-dense (8,128) store

    return kernel


def cv_cauchy_error(x, y, c=1.0, *, block_rows=1024, chunk_rows=256,
                    use_bf16_log=False):
    """CVCauchyError.forward(x, y): sum(c^2/2 * log(1 + |x-y|^2/c^2))."""
    x = jnp.asarray(x)
    y = jnp.asarray(y)
    assert x.shape == y.shape, "x and y must have the same shape"

    # Single unavoidable XLA pass: complex -> f32 planes, with x - y fused in.
    d = x - y
    is_complex = jnp.iscomplexobj(d)

    c2 = jnp.square(jnp.asarray(c, dtype=jnp.float32))   # c may be traced
    scale = 0.5 * c2
    inv_c2 = (1.0 / c2).astype(jnp.float32)

    m = int(d.size)
    dflat = d.reshape(-1)
    m_floor = (m // _LANES) * _LANES
    rows = m_floor // _LANES

    # Sub-row tail (< 128 elements): tiny, handled with plain jnp (no pad pass).
    if m_floor < m:
        tail = dflat[m_floor:]
        if is_complex:
            tmag2 = (jnp.real(tail).astype(jnp.float32) ** 2
                     + jnp.imag(tail).astype(jnp.float32) ** 2)
        else:
            tmag2 = tail.astype(jnp.float32) ** 2
        tail_sum = jnp.sum(jnp.log(1.0 + tmag2 * inv_c2))
    else:
        tail_sum = jnp.float32(0.0)

    if rows == 0:
        return scale * tail_sum

    main = dflat[:m_floor]
    if is_complex:
        planes = (jnp.real(main).astype(jnp.float32).reshape(rows, _LANES),
                  jnp.imag(main).astype(jnp.float32).reshape(rows, _LANES))
    else:
        planes = (main.astype(jnp.float32).reshape(rows, _LANES),)

    # Block / chunk geometry (all multiples of 8 rows, block = whole chunks).
    if rows >= block_rows:
        br = block_rows
    else:
        br = ((rows + _SUBLANES - 1) // _SUBLANES) * _SUBLANES
    cr = max(_SUBLANES, (min(chunk_rows, br) // _SUBLANES) * _SUBLANES)
    br = ((br + cr - 1) // cr) * cr
    grid = (rows + br - 1) // br
    need_mask = (rows % br) != 0

    kernel = _make_kernel(is_complex=is_complex, block_rows=br, chunk_rows=cr,
                          total_rows=rows, need_mask=need_mask,
                          use_bf16_log=use_bf16_log)

    plane_spec = pl.BlockSpec((br, _LANES), lambda b: (b, 0))
    smem_spec = pl.BlockSpec(memory_space=pltpu.MemorySpace.SMEM)

    partials = pl.pallas_call(
        kernel,
        out_shape=jax.ShapeDtypeStruct((grid, _SUBLANES, _LANES), jnp.float32),
        grid_spec=pltpu.PrefetchScalarGridSpec(
            num_scalar_prefetch=0,
            grid=(grid,),
            in_specs=[smem_spec] + [plane_spec] * len(planes),
            out_specs=pl.BlockSpec((1, _SUBLANES, _LANES), lambda b: (b, 0, 0)),
        ),
        compiler_params=pltpu.CompilerParams(
            dimension_semantics=("parallel",)),
    )(inv_c2.reshape(1, 1), *planes)

    return scale * (jnp.sum(partials) + tail_sum)


def _ref_cv_cauchy_error(x, y, c=1.0):
    """Independent pure-JAX reference (mirrors the PyTorch forward)."""
    c2 = float(c) ** 2
    return (c2 / 2.0 * jnp.log(1.0 + jnp.abs(x - y) ** 2 / c2)).sum()


if __name__ == "__main__":
    key = jax.random.PRNGKey(0)
    k1, k2, k3, k4 = jax.random.split(key, 4)

    # Module-consistent small shapes: complex64 "labels", batch=2, C=4, 16x16.
    N, C, H, W = 2, 4, 16, 16
    x = (jax.random.normal(k1, (N, C, H, W), jnp.float32)
         + 1j * jax.random.normal(k2, (N, C, H, W), jnp.float32)).astype(jnp.complex64)
    y = (jax.random.normal(k3, (N, C, H, W), jnp.float32)
         + 1j * jax.random.normal(k4, (N, C, H, W), jnp.float32)).astype(jnp.complex64)

    out = jax.block_until_ready(cv_cauchy_error(x, y))
    ref = jax.block_until_ready(_ref_cv_cauchy_error(x, y))
    assert jnp.allclose(out, ref, rtol=1e-5, atol=1e-5), (out, ref)

    # Ragged size (sub-row tail + masked rows in the last block) and non-unit c.
    k5, k6 = jax.random.split(k4)
    x2 = (jax.random.normal(k5, (3, 50), jnp.float32)
          + 1j * jax.random.normal(k6, (3, 50), jnp.float32)).astype(jnp.complex64)
    y2 = jnp.zeros_like(x2)
    out2 = jax.block_until_ready(cv_cauchy_error(x2, y2, c=2.0))
    ref2 = jax.block_until_ready(_ref_cv_cauchy_error(x2, y2, c=2.0))
    assert jnp.allclose(out2, ref2, rtol=1e-5, atol=1e-5), (out2, ref2)

    # Real-dtype fast path (single-plane kernel), ragged size, non-static c.
    k7, k8 = jax.random.split(k5)
    x3 = jax.random.normal(k7, (5, 37), jnp.float32)
    y3 = jax.random.normal(k8, (5, 37), jnp.float32)
    out3 = jax.block_until_ready(cv_cauchy_error(x3, y3, c=jnp.float32(0.5)))
    ref3 = jax.block_until_ready(_ref_cv_cauchy_error(x3, y3, c=0.5))
    assert jnp.allclose(out3, ref3, rtol=1e-5, atol=1e-5), (out3, ref3)

    print("KERNEL_OK")
</pallas_src>

<mosaic_0001>
module attributes {stable_mosaic.version = 11 : i64} {
  func.func @kernel(%arg0: i32, %arg1: memref<1x1xf32, #tpu.memory_space<smem>>, %arg2: memref<16x128xf32, #tpu.memory_space<vmem>>, %arg3: memref<16x128xf32, #tpu.memory_space<vmem>>, %arg4: memref<1x8x128xf32, #tpu.memory_space<vmem>>) attributes {dimension_semantics = [#tpu.dimension_semantics<parallel>], iteration_bounds = array<i64: 1>, scalar_prefetch = 0 : i64, scratch_operands = 0 : i64, tpu.core_type = #tpu.core_type<tc>, window_params = [{transform_indices = @transform_0, window_bounds = array<i64: 1, 1>}, {transform_indices = @transform_1, window_bounds = array<i64: 16, 128>}, {transform_indices = @transform_2, window_bounds = array<i64: 16, 128>}, {transform_indices = @transform_3, window_bounds = array<i64: 1, 8, 128>}]} {
    %c0 = arith.constant 0 : index
    %c0_0 = arith.constant 0 : index
    %0 = memref.load %arg1[%c0, %c0_0] : memref<1x1xf32, #tpu.memory_space<smem>>
    %cst = arith.constant 0.000000e+00 : f32
    %1 = vector.broadcast %cst : f32 to vector<8x128xf32>
    %c0_1 = arith.constant 0 : index
    %c0_2 = arith.constant 0 : index
    %2 = vector.load %arg2[%c0_1, %c0_2] : memref<16x128xf32, #tpu.memory_space<vmem>>, vector<16x128xf32>
    %3 = arith.mulf %2, %2 : vector<16x128xf32>
    %c0_3 = arith.constant 0 : index
    %c0_4 = arith.constant 0 : index
    %4 = vector.load %arg3[%c0_3, %c0_4] : memref<16x128xf32, #tpu.memory_space<vmem>>, vector<16x128xf32>
    %5 = arith.mulf %4, %4 : vector<16x128xf32>
    %6 = arith.addf %3, %5 : vector<16x128xf32>
    %7 = vector.broadcast %0 : f32 to vector<16x128xf32>
    %8 = arith.mulf %6, %7 : vector<16x128xf32>
    %cst_5 = arith.constant 1.000000e+00 : f32
    %9 = vector.broadcast %cst_5 : f32 to vector<16x128xf32>
    %10 = arith.addf %9, %8 : vector<16x128xf32>
    %11 = math.log %10 : vector<16x128xf32>
    %12 = vector.shape_cast %11 : vector<16x128xf32> to vector<2x8x128xf32>
    %cst_6 = arith.constant dense<0.000000e+00> : vector<8x128xf32>
    %13 = vector.multi_reduction <add>, %12, %cst_6 [0] : vector<2x8x128xf32> to vector<8x128xf32>
    %14 = arith.addf %1, %13 : vector<8x128xf32>
    %c0_7 = arith.constant 0 : index
    %c0_8 = arith.constant 0 : index
    %c0_9 = arith.constant 0 : index
    %15 = vector.load %arg4[%c0_7, %c0_8, %c0_9] : memref<1x8x128xf32, #tpu.memory_space<vmem>>, vector<1x8x128xf32>
    %16 = vector.shape_cast %15 : vector<1x8x128xf32> to vector<8x128xf32>
    %17 = vector.shape_cast %14 : vector<8x128xf32> to vector<1x8x128xf32>
    tpu.vector_store %arg4[%c0_7, %c0_8, %c0_9], %17 {strides = array<i32>} : memref<1x8x128xf32, #tpu.memory_space<vmem>>, vector<1x8x128xf32>,
    return
  }
  func.func @transform_0(%arg0: i32) -> (i32, i32) {
    %c0_i32 = arith.constant 0 : i32
    %c0_i32_0 = arith.constant 0 : i32
    %c0_i32_1 = arith.constant 0 : i32
    return %c0_i32, %c0_i32_0 : i32, i32
  }
  func.func @transform_1(%arg0: i32) -> (i32, i32) {
    %c0_i32 = arith.constant 0 : i32
    %c0_i32_0 = arith.constant 0 : i32
    return %arg0, %c0_i32 : i32, i32
  }
  func.func @transform_2(%arg0: i32) -> (i32, i32) {
    %c0_i32 = arith.constant 0 : i32
    %c0_i32_0 = arith.constant 0 : i32
    return %arg0, %c0_i32 : i32, i32
  }
  func.func @transform_3(%arg0: i32) -> (i32, i32, i32) {
    %c0_i32 = arith.constant 0 : i32
    %c0_i32_0 = arith.constant 0 : i32
    %c0_i32_1 = arith.constant 0 : i32
    return %arg0, %c0_i32, %c0_i32_0 : i32, i32, i32
  }
}

</mosaic_0001>

<bundles_post_ra>
// kernel: tpu_custom_call.1
= control target key start
LH: loop header
LB: loop body
LE: loop exit
PB: predicated region body
PF: predicated region fallthrough
CT: control target
= control target key end

     0   :  { %9 = vsyncpa [#allocation4], 0  ;;  %s195_s0 = inlined_call_operand.<no memory space> [shape: f32[1,1], index: 0, kind: input, shape index: {}]   ;;  %s196_s1 = inlined_call_operand.hbm [shape: f32[16,128], index: 1, kind: input, shape index: {}]   ;;  %s197_s2 = inlined_call_operand.hbm [shape: f32[16,128], index: 2, kind: input, shape index: {}]   ;;  %s198_s3 = inlined_call_operand.hbm [shape: f32[1,8,128], index: 3, kind: output, shape index: {}]  }
   0x1   :  { %10 = vsyncpa [#allocation7], 0 }
   0x2   :  { %11 = vsyncpa [#allocation5], 0  ;;  %s158_s12 = smov [#allocation3]  }
   0x3   :  { %s19_s13 = sshll.u32 %s158_s12, 4  ;;  %s20_s13 = int_to_ptr.vmem [resolvable:$true] %s19_s13 }
   0x4   :  { %s100_s14 = scalar_lea.vmem %s20_s13, 256  ;;  %p105_p1 = scmp.lt.s32.totalorder %s20_s13, %s20_s13 }
   0x5   :  { %p101_p0 = scmp.ne.s32.totalorder %s20_s13, %s100_s14  ;;  %p106_p2 = scmp.lt.s32.totalorder %s100_s14, %s100_s14 }
   0x7   :  { %p107_p3 = por %p106_p2, %p105_p1 }
   0x9   :  { %p108_p4 = pnand %p107_p3, %p101_p0 }
   0xb   :  { %111 = shalt.err (!%p108_p4)
}
   0xc   :  { %s159_s15 = smov 128   ;;  %s160_s16 = smov 8  }
   0xd   :  { %25 = dma.hbm_to_vmem [thread:$0]  %s196_s1, 256, %s20_s13, [#allocation4], %s159_s15, %s159_s15, %s160_s16  }
   0xe   :  { %s161_s19 = smov [#allocation6]  }
   0xf   :  { %s31_s20 = sshll.u32 %s161_s19, 4  ;;  %s32_s20 = int_to_ptr.vmem [resolvable:$true] %s31_s20 }
  0x10   :  { %s120_s21 = scalar_lea.vmem %s32_s20, 256  ;;  %p125_p6 = scmp.lt.s32.totalorder %s32_s20, %s32_s20 }
  0x11   :  { %p121_p5 = scmp.ne.s32.totalorder %s32_s20, %s120_s21  ;;  %p126_p7 = scmp.lt.s32.totalorder %s120_s21, %s120_s21 }
  0x13   :  { %p127_p8 = por %p126_p7, %p125_p6 }
  0x15   :  { %p128_p9 = pnand %p127_p8, %p121_p5 }
  0x17   :  { %131 = shalt.err (!%p128_p9)
}
  0x18   :  { %37 = dma.hbm_to_vmem [thread:$0]  %s197_s2, 256, %s32_s20, [#allocation7], %s159_s15, %s159_s15, %s160_s16  }
  0x19   :  { %152 = dma.done.wait [#allocation4], 256  }
  0x1a   :  { %153 = vsyncadd [#allocation4], 4294967040 }
  0x1b   :  { %154 = dma.done.wait [#allocation7], 256  }
  0x1c   :  { %155 = vsyncadd [#allocation7], 4294967040  ;;  %v45_v0 = vld [vmem:[#allocation3] sm:$0xff]  ;;  %v46_v1 = vld [vmem:[#allocation3 + $0x8] sm:$0xff]  ;;  %v55_v8 = vstv %s195_s0  ;;  %s162_s2 = smov [#allocation8]  }
  0x1d   :  { %v49_v2 = vld [vmem:[#allocation6] sm:$0xff]  ;;  %v47_v3 = vmul.f32 %v45_v0, %v45_v0  ;;  %v48_v4 = vmul.f32 %v46_v1, %v46_v1  ;;  %v50_v5 = vld [vmem:[#allocation6 + $0x8] sm:$0xff]  ;;  %s73_s25 = sshll.u32 %s162_s2, 4  ;;  %s74_s25 = int_to_ptr.vmem [resolvable:$true] %s73_s25 }
  0x1e   :  { %v51_v6 = vmul.f32 %v49_v2, %v49_v2  ;;  %v52_v7 = vmul.f32 %v50_v5, %v50_v5  ;;  %s132_s26 = scalar_lea.vmem %s74_s25, 128  ;;  %p137_p11 = scmp.lt.s32.totalorder %s74_s25, %s74_s25 }
  0x1f   :  { %p133_p10 = scmp.ne.s32.totalorder %s74_s25, %s132_s26  ;;  %p138_p12 = scmp.lt.s32.totalorder %s132_s26, %s132_s26 }
  0x20   :  { %v53_v9 = vadd.f32 %v51_v6, %v47_v3  ;;  %v54_v10 = vadd.f32 %v52_v7, %v48_v4 }
  0x21   :  { %p139_p13 = por %p138_p12, %p137_p11 }
  0x22   :  { %v56_v11 = vmul.f32 %v55_v8, %v53_v9  ;;  %v57_v12 = vmul.f32 %v55_v8, %v54_v10 }
  0x23   :  { %p140_p0 = pnand %p139_p13, %p133_p10 }
  0x24   :  { %v58_v13 = vadd.f32 1.0, %v56_v11  ;;  %v59_v14 = vadd.f32 1.0, %v57_v12 }
  0x26   :  { %88 = vlog2.f32 %v58_v13 }
  0x27   :  { %90 = vlog2.f32 %v59_v14 }
  0x33   :  { %v89_v15 = vpop.eup %88 }
  0x34   :  { %v91_v16 = vpop.eup %90  ;;  %v61_v17 = vmul.f32 0.6931472, %v89_v15 }
  0x35   :  { %v63_v18 = vmul.f32 0.6931472, %v91_v16 }
  0x37   :  { %v64_v19 = vadd.f32 %v63_v18, %v61_v17 }
  0x39   :  { %66 = vst [vmem:[#allocation8] sm:$0xff] %v64_v19 }
  0x3a   :  { %143 = shalt.err (!%p140_p0)
}
  0x3b   :  { %76 = dma.vmem_to_hbm [thread:$0]  %s74_s25, 128, %s198_s3, [#allocation5]  }
  0x3c   :  { %156 = dma.done.wait [#allocation5], 128  }
  0x3d   :  { %157 = vsyncadd [#allocation5], 4294967168 }
  0x3e   :  { %80 = vsyncpa [#allocation4], 1 }
  0x3f   :  { %81 = vsyncpa [#allocation7], 1 }
  0x40   :  { %82 = vsyncpa [#allocation5], 1 }

</bundles_post_ra>
